<compile_context>
chip_gen: v6e
topology: v6e:2x2x1
jax: 0.10.0
libtpu: 0.0.40
codegen_flags: <defaults>
</compile_context>

<pallas_src>
import functools

import jax
import jax.numpy as jnp
from jax.experimental import pallas as pl
from jax.experimental.pallas import tpu as pltpu

_EPS = 1e-6
_LANES = 128
_SUBLANES = 8
_TILE = _SUBLANES * _LANES                 # 1024 elements = one f32 vreg
_TARGET_BLOCK_BYTES = 2 * 1024 * 1024      # HBM bytes per input per grid step
_VMEM_LIMIT_BYTES = 40 * 1024 * 1024       # 2in x 2buf x 2MiB + f32 temps + slack


def _is_v7x():
    """Conservative v7x (2 TensorCores / chip) detection; defaults to False."""
    try:
        if "7" in jax.devices()[0].device_kind.lower():
            return True
    except Exception:
        pass
    try:
        info = pltpu.get_tpu_info()
        return "7" in str(getattr(info, "chip_version",
                                  getattr(info, "version", "")))
    except Exception:
        return False


def _charbonnier_partial_kernel(x_ref, y_ref, o_ref, *, m_rows, block_rows,
                                blocks_per_core, needs_mask):
    """One (block_rows, 128) step: accumulate folded Charbonnier sums into the
    per-core (8, 128) output block (resident across the reduction axis)."""
    i = pl.program_id(1)

    @pl.when(i == 0)
    def _():
        o_ref[...] = jnp.zeros_like(o_ref)

    # In-kernel cast: HBM traffic stays at the (possibly bf16) source dtype.
    d = x_ref[...].astype(jnp.float32) - y_ref[...].astype(jnp.float32)
    err = jnp.sqrt(d * d + jnp.float32(_EPS))

    def fold(v):
        # (block_rows, 128) -> (8, 128) sublane-folded partial sums; the single
        # expensive cross-lane reduction happens once, in the wrapper (XLA).
        return v.reshape(block_rows // _SUBLANES, _SUBLANES, _LANES).sum(axis=0)

    if needs_mask:
        # `needs_mask` is a static bool: aligned inputs compile without any
        # mask code.  Row-count compare (rows = n / 128) cannot overflow int32.
        block_start = (pl.program_id(0) * blocks_per_core + i) * block_rows

        @pl.when(block_start + block_rows <= m_rows)           # steady state
        def _():
            o_ref[...] += fold(err)

        @pl.when(block_start + block_rows > m_rows)            # boundary block
        def _():
            row = jax.lax.broadcasted_iota(jnp.int32, err.shape, 0)
            # vselect (NOT multiply-by-mask) so NaN/Inf from out-of-bounds
            # garbage rows never reaches the sum.
            o_ref[...] += fold(jnp.where(block_start + row < m_rows, err,
                                         jnp.float32(0.0)))
    else:
        o_ref[...] += fold(err)


def _charbonnier_partial_sums(x2, y2, num_cores):
    """Returns (num_cores*8, 128) f32 partial sums of sqrt((x-y)^2 + eps)."""
    m_rows = x2.shape[0]
    itemsize = x2.dtype.itemsize

    # Dtype-aware block sizing: ~2 MiB per input per step (4096 rows f32,
    # 8192 rows bf16) amortizes the ~0.35us fixed per-step pipeline cost.
    target_rows = max(_SUBLANES,
                      _TARGET_BLOCK_BYTES // (_LANES * itemsize)
                      // _SUBLANES * _SUBLANES)
    block_rows = max(_SUBLANES,
                     min(target_rows, m_rows // _SUBLANES * _SUBLANES))
    nblocks = pl.cdiv(m_rows, block_rows)

    if nblocks < 2:
        num_cores = 1                       # nothing to shard across cores
    blocks_per_core = pl.cdiv(nblocks, num_cores)
    # With an odd block count on 2 cores, the second core gets one duplicate
    # (clamped) block index; the in-kernel row mask zeroes its contribution.
    needs_clamp = num_cores * blocks_per_core > nblocks
    needs_mask = num_cores * blocks_per_core * block_rows != m_rows

    def in_index_map(c, i):
        b = c * blocks_per_core + i
        if needs_clamp:
            b = jnp.minimum(b, nblocks - 1)
        return (b, 0)

    kernel = functools.partial(
        _charbonnier_partial_kernel,
        m_rows=m_rows, block_rows=block_rows,
        blocks_per_core=blocks_per_core, needs_mask=needs_mask)

    n_main = m_rows * _LANES
    return pl.pallas_call(
        kernel,
        out_shape=jax.ShapeDtypeStruct((num_cores * _SUBLANES, _LANES),
                                       jnp.float32),
        grid_spec=pltpu.PrefetchScalarGridSpec(
            num_scalar_prefetch=0,
            grid=(num_cores, blocks_per_core),
            in_specs=[
                pl.BlockSpec((block_rows, _LANES), in_index_map),
                pl.BlockSpec((block_rows, _LANES), in_index_map),
            ],
            # Each core owns one lane-dense (8, 128) partial-sum block,
            # resident across the inner reduction axis.
            out_specs=pl.BlockSpec((_SUBLANES, _LANES), lambda c, i: (c, 0)),
            # Default double-buffering kept; deeper pl.Buffered only pays if a
            # trace shows exposed per-step DMA (spend VMEM on block size here).
        ),
        compiler_params=pltpu.CompilerParams(
            # Leading axis shards rows across v7x's 2 TensorCores; the inner
            # reduction axis stays "arbitrary".  Plain "parallel" strings do
            # not change codegen, so single-core chips just use "arbitrary".
            dimension_semantics=(
                pltpu.CORE_PARALLEL if num_cores > 1 else "arbitrary",
                "arbitrary"),
            # Explicit limit: 2 inputs x 2 pipeline buffers x 2 MiB plus the
            # f32 intermediates of a bf16 block exceed v5e's 16 MiB default.
            vmem_limit_bytes=_VMEM_LIMIT_BYTES,
        ),
        # Tell XLA's scheduler this custom call is memory-bound.
        cost_estimate=pl.CostEstimate(
            flops=5 * n_main,
            transcendentals=n_main,
            bytes_accessed=2 * n_main * itemsize + num_cores * _TILE * 4),
    )(x2, y2)


def robust_l1_loss(X, Y, loss_weight=1.0):
    """Charbonnier / robust-L1 loss matching PyTorch RobustL1Loss.forward."""
    assert X.shape == Y.shape, "X and Y must have the same shape"
    n = X.size
    assert n > 0

    # Flatten: free metadata reshape for contiguous arrays; keep source dtype.
    xf = X.reshape(-1)
    yf = Y.reshape(-1)

    # Kernel handles the 128-aligned prefix; the <=127-element ragged tail is
    # reduced with plain jnp instead of padding both whole tensors in HBM.
    n_main = (n // _LANES) * _LANES
    if n_main < _TILE:
        n_main = 0          # too small for a kernel launch; plain jnp below

    total = jnp.zeros((), jnp.float32)
    if n_main:
        m_rows = n_main // _LANES
        if n_main == n:
            x2 = xf.reshape(m_rows, _LANES)
            y2 = yf.reshape(m_rows, _LANES)
        else:
            # TODO(synk): a non-lane-aligned prefix slice still materializes
            # one copy; a fully copy-free ragged path would need a manual-DMA
            # (memory_space=pl.ANY) kernel.
            x2 = xf[:n_main].reshape(m_rows, _LANES)
            y2 = yf[:n_main].reshape(m_rows, _LANES)

        num_cores = 2 if _is_v7x() else 1
        if num_cores > 1:
            try:
                partials = _charbonnier_partial_sums(x2, y2, num_cores)
            except Exception:
                # Defensive fallback if 2-TensorCore sharding is unsupported.
                partials = _charbonnier_partial_sums(x2, y2, 1)
        else:
            partials = _charbonnier_partial_sums(x2, y2, 1)
        total = total + jnp.sum(partials)

    if n_main != n:
        dx = xf[n_main:].astype(jnp.float32) - yf[n_main:].astype(jnp.float32)
        total = total + jnp.sum(jnp.sqrt(dx * dx + jnp.float32(_EPS)))

    return jnp.float32(loss_weight) * (total / jnp.float32(n))


if __name__ == "__main__":
    key = jax.random.PRNGKey(0)
    kx, ky, kx2, ky2 = jax.random.split(key, 4)

    # Small NCHW inputs consistent with a flow-style loss (lane-aligned path).
    shape = (2, 4, 16, 16)
    X = jax.random.normal(kx, shape, dtype=jnp.float32)
    Y = jax.random.normal(ky, shape, dtype=jnp.float32)
    loss = jax.block_until_ready(robust_l1_loss(X, Y, loss_weight=1.0))
    ref = jnp.mean(jnp.sqrt((X - Y) ** 2 + _EPS))
    assert jnp.allclose(loss, ref, rtol=1e-5, atol=1e-6), (loss, ref)

    # Ragged element count: exercises the in-kernel partial-block row mask and
    # the wrapper-side jnp tail path.
    shape2 = (3, 5, 33, 33)
    X2 = jax.random.normal(kx2, shape2, dtype=jnp.float32)
    Y2 = jax.random.normal(ky2, shape2, dtype=jnp.float32)
    loss2 = jax.block_until_ready(robust_l1_loss(X2, Y2, loss_weight=0.5))
    ref2 = 0.5 * jnp.mean(jnp.sqrt((X2 - Y2) ** 2 + _EPS))
    assert jnp.allclose(loss2, ref2, rtol=1e-5, atol=1e-6), (loss2, ref2)

    # bf16 inputs: dtype-aware block sizing + in-kernel f32 cast.
    Xb, Yb = X.astype(jnp.bfloat16), Y.astype(jnp.bfloat16)
    loss3 = jax.block_until_ready(robust_l1_loss(Xb, Yb, loss_weight=1.0))
    x32, y32 = Xb.astype(jnp.float32), Yb.astype(jnp.float32)
    ref3 = jnp.mean(jnp.sqrt((x32 - y32) ** 2 + _EPS))
    assert jnp.allclose(loss3, ref3, rtol=1e-5, atol=1e-6), (loss3, ref3)

    print("KERNEL_OK")
</pallas_src>

<mosaic_0001>
module attributes {stable_mosaic.version = 11 : i64} {
  func.func @_charbonnier_partial_kernel(%arg0: i32, %arg1: i32, %arg2: memref<16x128xf32, #tpu.memory_space<vmem>>, %arg3: memref<16x128xf32, #tpu.memory_space<vmem>>, %arg4: memref<8x128xf32, #tpu.memory_space<vmem>>) attributes {dimension_semantics = [#tpu.dimension_semantics<arbitrary>, #tpu.dimension_semantics<arbitrary>], iteration_bounds = array<i64: 1, 1>, scalar_prefetch = 0 : i64, scratch_operands = 0 : i64, tpu.core_type = #tpu.core_type<tc>, window_params = [{transform_indices = @transform_0, window_bounds = array<i64: 16, 128>}, {transform_indices = @transform_1, window_bounds = array<i64: 16, 128>}, {transform_indices = @transform_2, window_bounds = array<i64: 8, 128>}]} {
    %c0_i32 = arith.constant 0 : i32
    %0 = arith.cmpi eq, %arg1, %c0_i32 : i32
    %1 = arith.extui %0 : i1 to i32
    %c0_i32_0 = arith.constant 0 : i32
    %2 = arith.cmpi ne, %1, %c0_i32_0 : i32
    scf.if %2 {
      %cst_9 = arith.constant 0.000000e+00 : f32
      %15 = vector.broadcast %cst_9 : f32 to vector<8x128xf32>
      %c0_10 = arith.constant 0 : index
      %c0_11 = arith.constant 0 : index
      %16 = vector.load %arg4[%c0_10, %c0_11] : memref<8x128xf32, #tpu.memory_space<vmem>>, vector<8x128xf32>
      tpu.vector_store %arg4[%c0_10, %c0_11], %15 {strides = array<i32>} : memref<8x128xf32, #tpu.memory_space<vmem>>, vector<8x128xf32>,
    } else {
    }
    %c0 = arith.constant 0 : index
    %c0_1 = arith.constant 0 : index
    %3 = vector.load %arg2[%c0, %c0_1] : memref<16x128xf32, #tpu.memory_space<vmem>>, vector<16x128xf32>
    %c0_2 = arith.constant 0 : index
    %c0_3 = arith.constant 0 : index
    %4 = vector.load %arg3[%c0_2, %c0_3] : memref<16x128xf32, #tpu.memory_space<vmem>>, vector<16x128xf32>
    %5 = arith.subf %3, %4 : vector<16x128xf32>
    %6 = arith.mulf %5, %5 : vector<16x128xf32>
    %cst = arith.constant 9.99999997E-7 : f32
    %7 = vector.broadcast %cst : f32 to vector<16x128xf32>
    %8 = arith.addf %6, %7 : vector<16x128xf32>
    %9 = math.sqrt %8 : vector<16x128xf32>
    %c0_4 = arith.constant 0 : index
    %c0_5 = arith.constant 0 : index
    %10 = vector.load %arg4[%c0_4, %c0_5] : memref<8x128xf32, #tpu.memory_space<vmem>>, vector<8x128xf32>
    %11 = vector.shape_cast %9 : vector<16x128xf32> to vector<2x8x128xf32>
    %cst_6 = arith.constant dense<0.000000e+00> : vector<8x128xf32>
    %12 = vector.multi_reduction <add>, %11, %cst_6 [0] : vector<2x8x128xf32> to vector<8x128xf32>
    %13 = arith.addf %10, %12 : vector<8x128xf32>
    %c0_7 = arith.constant 0 : index
    %c0_8 = arith.constant 0 : index
    %14 = vector.load %arg4[%c0_7, %c0_8] : memref<8x128xf32, #tpu.memory_space<vmem>>, vector<8x128xf32>
    tpu.vector_store %arg4[%c0_7, %c0_8], %13 {strides = array<i32>} : memref<8x128xf32, #tpu.memory_space<vmem>>, vector<8x128xf32>,
    return
  }
  func.func @transform_0(%arg0: i32, %arg1: i32) -> (i32, i32) {
    %c1_i32 = arith.constant 1 : i32
    %0 = arith.muli %arg0, %c1_i32 : i32
    %1 = arith.addi %0, %arg1 : i32
    %c0_i32 = arith.constant 0 : i32
    %c0_i32_0 = arith.constant 0 : i32
    return %1, %c0_i32 : i32, i32
  }
  func.func @transform_1(%arg0: i32, %arg1: i32) -> (i32, i32) {
    %c1_i32 = arith.constant 1 : i32
    %0 = arith.muli %arg0, %c1_i32 : i32
    %1 = arith.addi %0, %arg1 : i32
    %c0_i32 = arith.constant 0 : i32
    %c0_i32_0 = arith.constant 0 : i32
    return %1, %c0_i32 : i32, i32
  }
  func.func @transform_2(%arg0: i32, %arg1: i32) -> (i32, i32) {
    %c0_i32 = arith.constant 0 : i32
    %c0_i32_0 = arith.constant 0 : i32
    return %arg0, %c0_i32 : i32, i32
  }
}

</mosaic_0001>

<bundles_post_ra>
// kernel: tpu_custom_call.1
= control target key start
LH: loop header
LB: loop body
LE: loop exit
PB: predicated region body
PF: predicated region fallthrough
CT: control target
= control target key end

     0   :  { %7 = vsyncpa [#allocation3], 0  ;;  %s206_s0 = inlined_call_operand.hbm [shape: f32[16,128], index: 0, kind: input, shape index: {}]   ;;  %s207_s1 = inlined_call_operand.hbm [shape: f32[16,128], index: 1, kind: input, shape index: {}]   ;;  %s208_s2 = inlined_call_operand.hbm [shape: f32[8,128], index: 2, kind: output, shape index: {}]  }
   0x1   :  { %8 = vsyncpa [#allocation6], 0 }
   0x2   :  { %9 = vsyncpa [#allocation4], 0  ;;  %s177_s9 = smov [#allocation2]  }
   0x3   :  { %s19_s10 = sshll.u32 %s177_s9, 4  ;;  %s20_s10 = int_to_ptr.vmem [resolvable:$true] %s19_s10 }
   0x4   :  { %s119_s11 = scalar_lea.vmem %s20_s10, 256  ;;  %p124_p1 = scmp.lt.s32.totalorder %s20_s10, %s20_s10 }
   0x5   :  { %p120_p0 = scmp.ne.s32.totalorder %s20_s10, %s119_s11  ;;  %p125_p2 = scmp.lt.s32.totalorder %s119_s11, %s119_s11 }
   0x7   :  { %p126_p3 = por %p125_p2, %p124_p1 }
   0x9   :  { %p127_p4 = pnand %p126_p3, %p120_p0 }
   0xb   :  { %130 = shalt.err (!%p127_p4)
}
   0xc   :  { %s178_s12 = smov 128   ;;  %s179_s13 = smov 8  }
   0xd   :  { %25 = dma.hbm_to_vmem [thread:$0]  %s206_s0, 256, %s20_s10, [#allocation3], %s178_s12, %s178_s12, %s179_s13  }
   0xe   :  { %s180_s16 = smov [#allocation5]  }
   0xf   :  { %s35_s17 = sshll.u32 %s180_s16, 4  ;;  %s36_s17 = int_to_ptr.vmem [resolvable:$true] %s35_s17 }
  0x10   :  { %s139_s18 = scalar_lea.vmem %s36_s17, 256  ;;  %p144_p6 = scmp.lt.s32.totalorder %s36_s17, %s36_s17 }
  0x11   :  { %p140_p5 = scmp.ne.s32.totalorder %s36_s17, %s139_s18  ;;  %p145_p7 = scmp.lt.s32.totalorder %s139_s18, %s139_s18 }
  0x13   :  { %p146_p8 = por %p145_p7, %p144_p6 }
  0x15   :  { %p147_p9 = pnand %p146_p8, %p140_p5 }
  0x17   :  { %150 = shalt.err (!%p147_p9)
}
  0x18   :  { %41 = dma.hbm_to_vmem [thread:$0]  %s207_s1, 256, %s36_s17, [#allocation6], %s178_s12, %s178_s12, %s179_s13  }
  0x19   :  { %171 = dma.done.wait [#allocation3], 256  }
  0x1a   :  { %172 = vsyncadd [#allocation3], 4294967040 }
  0x1b   :  { %173 = dma.done.wait [#allocation6], 256  }
  0x1c   :  { %174 = vsyncadd [#allocation6], 4294967040  ;;  %v57_v0 = vld [vmem:[#allocation2] sm:$0xff]  ;;  %v58_v1 = vld [vmem:[#allocation2 + $0x8] sm:$0xff]  ;;  %s181_s0 = smov [#allocation7]  }
  0x1d   :  { %v59_v2 = vld [vmem:[#allocation5] sm:$0xff]  ;;  %v60_v3 = vld [vmem:[#allocation5 + $0x8] sm:$0xff]  ;;  %s91_s1 = sshll.u32 %s181_s0, 4  ;;  %s92_s1 = int_to_ptr.vmem [resolvable:$true] %s91_s1 }
  0x1e   :  { %v61_v4 = vsub.f32 %v57_v0, %v59_v2  ;;  %v62_v5 = vsub.f32 %v58_v1, %v60_v3  ;;  %s151_s21 = scalar_lea.vmem %s92_s1, 128  ;;  %p156_p11 = scmp.lt.s32.totalorder %s92_s1, %s92_s1 }
  0x1f   :  { %p152_p10 = scmp.ne.s32.totalorder %s92_s1, %s151_s21  ;;  %p157_p12 = scmp.lt.s32.totalorder %s151_s21, %s151_s21 }
  0x20   :  { %v63_v6 = vmul.f32 %v61_v4, %v61_v4  ;;  %v64_v7 = vmul.f32 %v62_v5, %v62_v5 }
  0x21   :  { %p158_p13 = por %p157_p12, %p156_p11 }
  0x22   :  { %v65_v8 = vadd.f32 1e-06, %v63_v6  ;;  %v66_v9 = vadd.f32 1e-06, %v64_v7 }
  0x23   :  { %p159_p0 = pnand %p158_p13, %p152_p10 }
  0x24   :  { %107 = vrsqrt.f32 %v65_v8  ;;  %vm69_vm0 = vcmp.eq.f32.partialorder %v65_v8, inf  ;;  %v72_v11 = vand.u32 2147483648, %v65_v8  ;;  %vm71_vm1 = vcmp.eq.f32.partialorder %v65_v8, 0.0 }
  0x25   :  { %109 = vrsqrt.f32 %v66_v9  ;;  %vm76_vm2 = vcmp.eq.f32.partialorder %v66_v9, inf  ;;  %v79_v14 = vand.u32 2147483648, %v66_v9  ;;  %vm78_vm3 = vcmp.eq.f32.partialorder %v66_v9, 0.0 }
  0x31   :  { %v108_v10 = vpop.eup %107 }
  0x32   :  { %v110_v12 = vpop.eup %109  ;;  %v68_v13 = vmul.f32 %v108_v10, %v65_v8 }
  0x33   :  { %v75_v15 = vmul.f32 %v110_v12, %v66_v9 }
  0x34   :  { %v70_v16 = vsel %vm69_vm0, %v65_v8, %v68_v13 }
  0x35   :  { %v73_v17 = vsel %vm71_vm1, %v72_v11, %v70_v16  ;;  %v77_v18 = vsel %vm76_vm2, %v66_v9, %v75_v15 }
  0x36   :  { %v80_v19 = vsel %vm78_vm3, %v79_v14, %v77_v18 }
  0x37   :  { %v82_v20 = vadd.f32 %v80_v19, %v73_v17 }
  0x39   :  { %84 = vst [vmem:[#allocation7] sm:$0xff] %v82_v20 }
  0x3a   :  { %162 = shalt.err (!%p159_p0)
}
  0x3b   :  { %94 = dma.vmem_to_hbm [thread:$0]  %s92_s1, 128, %s208_s2, [#allocation4]  }
  0x3c   :  { %175 = dma.done.wait [#allocation4], 128  }
  0x3d   :  { %176 = vsyncadd [#allocation4], 4294967168 }
  0x3e   :  { %98 = vsyncpa [#allocation3], 1 }
  0x3f   :  { %99 = vsyncpa [#allocation6], 1 }
  0x40   :  { %100 = vsyncpa [#allocation4], 1 }

</bundles_post_ra>
